<compile_context>
chip_gen: v5e
topology: v5e:2x2
jax: 0.10.0
libtpu: 0.0.40
codegen_flags: <defaults>
</compile_context>

<pallas_src>
import jax
import jax.numpy as jnp
from jax import lax
from jax.experimental import pallas as pl
from jax.experimental.pallas import tpu as pltpu


# ---------------------------------------------------------------------------
# Tiling / VMEM-budget helpers
# ---------------------------------------------------------------------------

def _vmem_budgets():
    """(vmem_limit_bytes, input_budget_bytes) chosen per chip generation."""
    vmem_cap = 64 * 1024 * 1024  # conservative (v7x-like) fallback
    try:
        info = pltpu.get_tpu_info()
        vmem_cap = int(getattr(info, "vmem_capacity_bytes", vmem_cap))
    except Exception:
        pass
    if vmem_cap >= 96 * 1024 * 1024:
        # v5e / v6e: 128 MiB physical VMEM -> raise scoped limit & budget.
        return 64 * 1024 * 1024, 24 * 1024 * 1024
    # v7x: 64 MiB physical per TC -> keep conservative headroom.
    return 32 * 1024 * 1024, 12 * 1024 * 1024


def _sublane_multiple(itemsize):
    # Sub-32-bit dtypes pack along sublanes: (16,128) bf16, (32,128) int8/fp8.
    return {4: 8, 2: 16, 1: 32}.get(int(itemsize), 8)


def _pick_tile_rows(batch, num_classes, in_itemsize, input_budget_bytes,
                    sublane, target_block_bytes=2 * 1024 * 1024):
    """Batch-tile size: >= ~2 MiB per streamed block, within the VMEM budget.

    The budget (2 logits arrays x 2 pipeline buffers x tile x C) is charged at
    f32 width even for bf16 streams, because the kernel's f32 working set
    (upcasts + (TB, C) intermediates) is what actually has to fit.
    """
    eff_itemsize = max(4, int(in_itemsize))
    cap = input_budget_bytes // max(1, 4 * num_classes * eff_itemsize)
    # bytes-per-step target: ~2 MiB per double-buffered input block amortizes
    # the ~0.35 us per-grid-step overhead (85%+ of HBM roofline measured).
    target = target_block_bytes // max(1, num_classes * int(in_itemsize))
    tb = min(int(cap), int(target))
    tb = max(sublane, (tb // sublane) * sublane)
    if tb >= batch:
        return batch          # single full-batch block (full dims always legal)
    return tb                 # multiple of the packed sublane tile


# ---------------------------------------------------------------------------
# Kernel
# ---------------------------------------------------------------------------

def _make_kernel(inv_temp, batch_size, tile_rows, needs_row_mask):
    def kernel(ls_ref, lw_ref, beta_thr_ref, loss_sum_ref, mask_sum_ref):
        lw = lw_ref[...].astype(jnp.float32)                    # (TB, C)
        ls = ls_ref[...].astype(jnp.float32)                    # (TB, C)
        beta_thr = beta_thr_ref[...].astype(jnp.float32)        # (1, C)
        tb, c = lw.shape

        # softmax-max confidence without materializing the softmax:
        #   conf = max(softmax(lw/T)) = 1 / s,  s = sum(exp((lw - m)/T)).
        # max/argmax taken on UNSCALED lw (1/T > 0 preserves the argmax).
        m = jnp.max(lw, axis=-1, keepdims=True)                 # (TB, 1)
        s = jnp.sum(jnp.exp((lw - m) * inv_temp), axis=-1, keepdims=True)

        # argmax with torch's first-max-index tie-breaking; the boolean
        # col==yhat mask is reused for both gathers (no f32 one-hot).
        col = lax.broadcasted_iota(jnp.int32, lw.shape, 1)      # (TB, C)
        is_max = lw == m
        yhat = jnp.min(jnp.where(is_max, col, jnp.int32(c)), axis=-1,
                       keepdims=True)                           # (TB, 1)
        is_yhat = col == yhat                                   # (TB, C) bool

        # threshold already folded into beta_thr on the host.
        beta_thr_y = jnp.sum(jnp.where(is_yhat, beta_thr, 0.0), axis=-1,
                             keepdims=True)                     # (TB, 1)
        # FlexMatch mask:  1/s > thr*beta[y_hat]  <=>  1 > thr*beta[y_hat]*s
        mask = (1.0 > beta_thr_y * s).astype(jnp.float32)       # (TB, 1)

        # cross_entropy(logits_s, y_hat, reduction='none') = lse - ls[y_hat]
        m2 = jnp.max(ls, axis=-1, keepdims=True)
        lse = m2 + jnp.log(jnp.sum(jnp.exp(ls - m2), axis=-1, keepdims=True))
        picked = jnp.sum(jnp.where(is_yhat, ls, 0.0), axis=-1, keepdims=True)
        loss = lse - picked                                     # (TB, 1)

        loss_m = loss * mask

        def write(lc, mc):
            loss_sum_ref[...] = jnp.sum(lc).reshape(1, 1, 1)
            mask_sum_ref[...] = jnp.sum(mc).reshape(1, 1, 1)

        if not needs_row_mask:
            write(loss_m, mask)
        else:
            i = pl.program_id(0)
            last = pl.num_programs(0) - 1

            @pl.when(i != last)
            def _():
                write(loss_m, mask)

            @pl.when(i == last)
            def _():
                # Padded (garbage) rows of the partial last block may carry
                # NaN/Inf; jnp.where drops them.  Do NOT rewrite as `x*valid`
                # (NaN * 0 = NaN) or move the masking after the sum.
                row = i * tile_rows + lax.broadcasted_iota(
                    jnp.int32, (tb, 1), 0)
                valid = row < batch_size
                write(jnp.where(valid, loss_m, 0.0),
                      jnp.where(valid, mask, 0.0))

    return kernel


# ---------------------------------------------------------------------------
# Wrapper
# ---------------------------------------------------------------------------

def flexmatch_cross_entropy(logits_s, logits_w, y_hat_buffer,
                            num_classes, temperature, threshold,
                            tile_rows=None):
    """Returns (scalar loss, mu) matching FlexMatchCrossEntropy.forward."""
    B, C = logits_s.shape
    assert logits_w.shape == (B, C)
    assert C == num_classes
    # TODO(synk): for vocab-scale C the class axis would also need tiling with
    # an online softmax; here one full row of classes is assumed to fit VMEM.
    # TODO(synk): for tiny C (<=32) a lane-packing layout (128//C samples per
    # vreg row) would lift VPU efficiency ~8x on v7x/v6e-bf16; the natural
    # (N, C) layout is kept since it only matters when compute-bound.

    # beta = bincount(Y_hat buffer); beta = beta / (2*beta.max() - beta).
    # length=num_classes+1 and max over ALL bins (incl. the sentinel bin)
    # intentionally match the PyTorch reference.
    counts = jnp.bincount(y_hat_buffer, length=num_classes + 1).astype(jnp.float32)
    beta = counts / (2.0 * jnp.max(counts) - counts)
    # Fold the threshold in on the host -> no per-row threshold multiply.
    beta_thr = (float(threshold) * beta[:num_classes]).reshape(1, num_classes)
    beta_thr = beta_thr.astype(jnp.float32)

    itemsize = max(jnp.dtype(logits_s.dtype).itemsize,
                   jnp.dtype(logits_w.dtype).itemsize)
    sublane = _sublane_multiple(itemsize)
    vmem_limit_bytes, input_budget_bytes = _vmem_budgets()

    if tile_rows is None:
        tile_rows = _pick_tile_rows(B, C, itemsize, input_budget_bytes, sublane)
    else:
        tile_rows = max(sublane, (int(tile_rows) // sublane) * sublane)
        if tile_rows > B:
            tile_rows = B
    num_tiles = pl.cdiv(B, tile_rows)
    needs_row_mask = (B % tile_rows) != 0

    kernel = _make_kernel(1.0 / float(temperature), B, tile_rows, needs_row_mask)

    grid_spec = pltpu.PrefetchScalarGridSpec(
        num_scalar_prefetch=0,
        grid=(num_tiles,),
        in_specs=[
            # If a trace ever shows exposed input DMA at step boundaries,
            # bump these two specs to pipeline_mode=pl.Buffered(3).
            pl.BlockSpec((tile_rows, C), lambda i: (i, 0)),   # logits_s
            pl.BlockSpec((tile_rows, C), lambda i: (i, 0)),   # logits_w
            pl.BlockSpec((1, C), lambda i: (0, 0)),           # thr*beta (resident)
        ],
        out_specs=[
            # Per-tile partials -> disjoint output blocks -> "parallel" axis
            # (megacore-shardable on v7x) + better f32 accumulation accuracy.
            pl.BlockSpec((1, 1, 1), lambda i: (i, 0, 0)),     # sum(loss*mask)
            pl.BlockSpec((1, 1, 1), lambda i: (i, 0, 0)),     # sum(mask)
        ],
    )

    loss_parts, mask_parts = pl.pallas_call(
        kernel,
        grid_spec=grid_spec,
        out_shape=(
            jax.ShapeDtypeStruct((num_tiles, 1, 1), jnp.float32),
            jax.ShapeDtypeStruct((num_tiles, 1, 1), jnp.float32),
        ),
        compiler_params=pltpu.CompilerParams(
            dimension_semantics=("parallel",),
            vmem_limit_bytes=vmem_limit_bytes,
        ),
    )(logits_s, logits_w, beta_thr)        # no wrapper-side dtype upcast

    inv_b = 1.0 / float(B)
    loss = jnp.sum(loss_parts) * inv_b     # (loss * mask).mean()
    mu = jnp.sum(mask_parts) * inv_b       # the module's self.mu side effect
    return loss, mu


# ---------------------------------------------------------------------------
# Pure-JAX reference + tests
# ---------------------------------------------------------------------------

def _reference(logits_s, logits_w, y_hat_buffer, num_classes, temperature, threshold):
    logits_s = logits_s.astype(jnp.float32)
    logits_w = logits_w.astype(jnp.float32)
    probs = jax.nn.softmax(logits_w / temperature, axis=-1)
    c = jnp.max(probs, axis=-1)
    yhat = jnp.argmax(probs, axis=-1)
    counts = jnp.bincount(y_hat_buffer, length=num_classes + 1).astype(jnp.float32)
    beta = counts / (2.0 * jnp.max(counts) - counts)
    mask = (c > threshold * beta[yhat]).astype(jnp.float32)
    lse = jax.nn.logsumexp(logits_s, axis=-1)
    loss = lse - jnp.take_along_axis(logits_s, yhat[:, None], axis=-1)[:, 0]
    return jnp.mean(loss * mask), jnp.mean(mask)


if __name__ == "__main__":
    num_classes = 16
    num_samples = 8
    temperature = 0.5
    threshold = 0.95

    key = jax.random.PRNGKey(0)
    k1, k2, k3, k4, k5 = jax.random.split(key, 5)

    # ---- Test 1: module-default sizes, f32 inputs, single tile -------------
    logits_s = jax.random.normal(k1, (num_samples, num_classes), dtype=jnp.float32)
    logits_w = jax.random.normal(k2, (num_samples, num_classes), dtype=jnp.float32)
    # registered buffer = [num_classes] * num_samples
    y_hat_buffer = jnp.full((num_samples,), num_classes, dtype=jnp.int32)

    loss, mu = flexmatch_cross_entropy(
        logits_s, logits_w, y_hat_buffer, num_classes, temperature, threshold)
    loss = jax.block_until_ready(loss)
    mu = jax.block_until_ready(mu)
    ref_loss, ref_mu = _reference(
        logits_s, logits_w, y_hat_buffer, num_classes, temperature, threshold)
    assert jnp.allclose(loss, ref_loss, rtol=1e-5, atol=1e-5), (loss, ref_loss)
    assert jnp.allclose(mu, ref_mu, rtol=1e-5, atol=1e-5), (mu, ref_mu)

    # ---- Test 2: bf16 inputs streamed straight into the kernel -------------
    ls_bf = logits_s.astype(jnp.bfloat16)
    lw_bf = logits_w.astype(jnp.bfloat16)
    loss_bf, mu_bf = flexmatch_cross_entropy(
        ls_bf, lw_bf, y_hat_buffer, num_classes, temperature, threshold)
    loss_bf = jax.block_until_ready(loss_bf)
    ref_loss_bf, ref_mu_bf = _reference(
        ls_bf, lw_bf, y_hat_buffer, num_classes, temperature, threshold)
    assert jnp.allclose(loss_bf, ref_loss_bf, rtol=1e-4, atol=1e-4), (loss_bf, ref_loss_bf)
    assert jnp.allclose(mu_bf, ref_mu_bf, rtol=1e-4, atol=1e-4), (mu_bf, ref_mu_bf)

    # ---- Test 3: multi-tile grid, partial last tile, non-trivial beta ------
    B2, C2 = 260, 256
    ls2 = jax.random.normal(k3, (B2, C2), dtype=jnp.float32)
    lw2 = jax.random.normal(k4, (B2, C2), dtype=jnp.float32)
    buf2 = jax.random.randint(k5, (1000,), 0, C2 + 1, dtype=jnp.int32)
    loss2, mu2 = flexmatch_cross_entropy(
        ls2, lw2, buf2, C2, temperature, threshold, tile_rows=128)
    loss2 = jax.block_until_ready(loss2)
    mu2 = jax.block_until_ready(mu2)
    ref_loss2, ref_mu2 = _reference(ls2, lw2, buf2, C2, temperature, threshold)
    assert jnp.allclose(loss2, ref_loss2, rtol=1e-5, atol=1e-5), (loss2, ref_loss2)
    assert jnp.allclose(mu2, ref_mu2, rtol=1e-5, atol=1e-5), (mu2, ref_mu2)

    # ---- Test 4: auto tile selection on a larger batch (exercise budgets) --
    B3, C3 = 4096, 64
    ls3 = jax.random.normal(k3, (B3, C3), dtype=jnp.bfloat16)
    lw3 = jax.random.normal(k4, (B3, C3), dtype=jnp.bfloat16)
    buf3 = jax.random.randint(k5, (2048,), 0, C3 + 1, dtype=jnp.int32)
    loss3, mu3 = flexmatch_cross_entropy(
        ls3, lw3, buf3, C3, temperature, threshold)
    loss3 = jax.block_until_ready(loss3)
    mu3 = jax.block_until_ready(mu3)
    ref_loss3, ref_mu3 = _reference(ls3, lw3, buf3, C3, temperature, threshold)
    assert jnp.allclose(loss3, ref_loss3, rtol=1e-4, atol=1e-4), (loss3, ref_loss3)
    assert jnp.allclose(mu3, ref_mu3, rtol=1e-4, atol=1e-4), (mu3, ref_mu3)

    print("KERNEL_OK")
</pallas_src>

<mosaic_0001>
module attributes {stable_mosaic.version = 11 : i64} {
  func.func @kernel(%arg0: i32, %arg1: memref<8x16xf32, #tpu.memory_space<vmem>>, %arg2: memref<8x16xf32, #tpu.memory_space<vmem>>, %arg3: memref<1x16xf32, #tpu.memory_space<vmem>>, %arg4: memref<1x1x1xf32, #tpu.memory_space<vmem>>, %arg5: memref<1x1x1xf32, #tpu.memory_space<vmem>>) attributes {dimension_semantics = [#tpu.dimension_semantics<parallel>], iteration_bounds = array<i64: 1>, scalar_prefetch = 0 : i64, scratch_operands = 0 : i64, tpu.core_type = #tpu.core_type<tc>, window_params = [{transform_indices = @transform_0, window_bounds = array<i64: 8, 16>}, {transform_indices = @transform_1, window_bounds = array<i64: 8, 16>}, {pipeline_mode = #tpu.pipeline_mode<synchronous>, transform_indices = @transform_2, window_bounds = array<i64: 1, 16>}, {transform_indices = @transform_3, window_bounds = array<i64: 1, 1, 1>}, {transform_indices = @transform_4, window_bounds = array<i64: 1, 1, 1>}]} {
    %c0 = arith.constant 0 : index
    %c0_0 = arith.constant 0 : index
    %0 = vector.load %arg2[%c0, %c0_0] : memref<8x16xf32, #tpu.memory_space<vmem>>, vector<8x16xf32>
    %c0_1 = arith.constant 0 : index
    %c0_2 = arith.constant 0 : index
    %1 = vector.load %arg1[%c0_1, %c0_2] : memref<8x16xf32, #tpu.memory_space<vmem>>, vector<8x16xf32>
    %c0_3 = arith.constant 0 : index
    %c0_4 = arith.constant 0 : index
    %2 = vector.load %arg3[%c0_3, %c0_4] : memref<1x16xf32, #tpu.memory_space<vmem>>, vector<1x16xf32>
    %cst = arith.constant dense<0xFF800000> : vector<8xf32>
    %3 = vector.multi_reduction <maximumf>, %0, %cst [1] : vector<8x16xf32> to vector<8xf32>
    %4 = vector.shape_cast %3 : vector<8xf32> to vector<8x1xf32>
    %5 = vector.broadcast %4 : vector<8x1xf32> to vector<8x16xf32>
    %6 = arith.subf %0, %5 : vector<8x16xf32>
    %cst_5 = arith.constant 2.000000e+00 : f32
    %7 = vector.broadcast %cst_5 : f32 to vector<8x16xf32>
    %8 = arith.mulf %6, %7 : vector<8x16xf32>
    %9 = math.exp %8 : vector<8x16xf32>
    %cst_6 = arith.constant dense<0.000000e+00> : vector<8xf32>
    %10 = vector.multi_reduction <add>, %9, %cst_6 [1] : vector<8x16xf32> to vector<8xf32>
    %11 = vector.shape_cast %10 : vector<8xf32> to vector<8x1xf32>
    %12 = tpu.iota {dimensions = array<i32: 1>} : vector<8x16xi32>
    %13 = vector.broadcast %4 : vector<8x1xf32> to vector<8x16xf32>
    %14 = arith.cmpf oeq, %0, %13 : vector<8x16xf32>
    %c16_i32 = arith.constant 16 : i32
    %15 = vector.broadcast %c16_i32 : i32 to vector<8x16xi32>
    %16 = arith.select %14, %12, %15 : vector<8x16xi1>, vector<8x16xi32>
    %cst_7 = arith.constant dense<2147483647> : vector<8xi32>
    %17 = vector.multi_reduction <minsi>, %16, %cst_7 [1] : vector<8x16xi32> to vector<8xi32>
    %18 = vector.shape_cast %17 : vector<8xi32> to vector<8x1xi32>
    %19 = vector.broadcast %18 : vector<8x1xi32> to vector<8x16xi32>
    %20 = arith.cmpi eq, %12, %19 : vector<8x16xi32>
    %cst_8 = arith.constant 0.000000e+00 : f32
    %21 = vector.shape_cast %2 : vector<1x16xf32> to vector<1x16xf32>
    %22 = vector.broadcast %21 : vector<1x16xf32> to vector<8x16xf32>
    %23 = vector.broadcast %cst_8 : f32 to vector<8x16xf32>
    %24 = arith.select %20, %22, %23 : vector<8x16xi1>, vector<8x16xf32>
    %cst_9 = arith.constant dense<0.000000e+00> : vector<8xf32>
    %25 = vector.multi_reduction <add>, %24, %cst_9 [1] : vector<8x16xf32> to vector<8xf32>
    %26 = vector.shape_cast %25 : vector<8xf32> to vector<8x1xf32>
    %27 = arith.mulf %26, %11 : vector<8x1xf32>
    %cst_10 = arith.constant 1.000000e+00 : f32
    %28 = vector.broadcast %cst_10 : f32 to vector<8x1xf32>
    %29 = arith.cmpf olt, %27, %28 : vector<8x1xf32>
    %30 = arith.extui %29 : vector<8x1xi1> to vector<8x1xi32>
    %31 = arith.sitofp %30 : vector<8x1xi32> to vector<8x1xf32>
    %cst_11 = arith.constant dense<0xFF800000> : vector<8xf32>
    %32 = vector.multi_reduction <maximumf>, %1, %cst_11 [1] : vector<8x16xf32> to vector<8xf32>
    %33 = vector.shape_cast %32 : vector<8xf32> to vector<8x1xf32>
    %34 = vector.broadcast %33 : vector<8x1xf32> to vector<8x16xf32>
    %35 = arith.subf %1, %34 : vector<8x16xf32>
    %36 = math.exp %35 : vector<8x16xf32>
    %cst_12 = arith.constant dense<0.000000e+00> : vector<8xf32>
    %37 = vector.multi_reduction <add>, %36, %cst_12 [1] : vector<8x16xf32> to vector<8xf32>
    %38 = vector.shape_cast %37 : vector<8xf32> to vector<8x1xf32>
    %39 = math.log %38 : vector<8x1xf32>
    %40 = arith.addf %33, %39 : vector<8x1xf32>
    %cst_13 = arith.constant 0.000000e+00 : f32
    %41 = vector.broadcast %cst_13 : f32 to vector<8x16xf32>
    %42 = arith.select %20, %1, %41 : vector<8x16xi1>, vector<8x16xf32>
    %cst_14 = arith.constant dense<0.000000e+00> : vector<8xf32>
    %43 = vector.multi_reduction <add>, %42, %cst_14 [1] : vector<8x16xf32> to vector<8xf32>
    %44 = vector.shape_cast %43 : vector<8xf32> to vector<8x1xf32>
    %45 = arith.subf %40, %44 : vector<8x1xf32>
    %46 = arith.mulf %45, %31 : vector<8x1xf32>
    %47 = vector.shape_cast %46 : vector<8x1xf32> to vector<1x8x1xf32>
    %cst_15 = arith.constant dense<0.000000e+00> : vector<1xf32>
    %48 = vector.multi_reduction <add>, %47, %cst_15 [1, 2] : vector<1x8x1xf32> to vector<1xf32>
    %49 = vector.shape_cast %48 : vector<1xf32> to vector<1x1x1xf32>
    %50 = vector.extract %49[0, 0, 0] : f32 from vector<1x1x1xf32>
    %51 = vector.broadcast %50 : f32 to vector<1x1x1xf32>
    %c0_16 = arith.constant 0 : index
    %c0_17 = arith.constant 0 : index
    %c0_18 = arith.constant 0 : index
    %52 = vector.load %arg4[%c0_16, %c0_17, %c0_18] : memref<1x1x1xf32, #tpu.memory_space<vmem>>, vector<1x1x1xf32>
    tpu.vector_store %arg4[%c0_16, %c0_17, %c0_18], %51 {strides = array<i32>} : memref<1x1x1xf32, #tpu.memory_space<vmem>>, vector<1x1x1xf32>,
    %53 = vector.shape_cast %31 : vector<8x1xf32> to vector<1x8x1xf32>
    %cst_19 = arith.constant dense<0.000000e+00> : vector<1xf32>
    %54 = vector.multi_reduction <add>, %53, %cst_19 [1, 2] : vector<1x8x1xf32> to vector<1xf32>
    %55 = vector.shape_cast %54 : vector<1xf32> to vector<1x1x1xf32>
    %56 = vector.extract %55[0, 0, 0] : f32 from vector<1x1x1xf32>
    %57 = vector.broadcast %56 : f32 to vector<1x1x1xf32>
    %c0_20 = arith.constant 0 : index
    %c0_21 = arith.constant 0 : index
    %c0_22 = arith.constant 0 : index
    %58 = vector.load %arg5[%c0_20, %c0_21, %c0_22] : memref<1x1x1xf32, #tpu.memory_space<vmem>>, vector<1x1x1xf32>
    tpu.vector_store %arg5[%c0_20, %c0_21, %c0_22], %57 {strides = array<i32>} : memref<1x1x1xf32, #tpu.memory_space<vmem>>, vector<1x1x1xf32>,
    return
  }
  func.func @transform_0(%arg0: i32) -> (i32, i32) {
    %c0_i32 = arith.constant 0 : i32
    %c0_i32_0 = arith.constant 0 : i32
    return %arg0, %c0_i32 : i32, i32
  }
  func.func @transform_1(%arg0: i32) -> (i32, i32) {
    %c0_i32 = arith.constant 0 : i32
    %c0_i32_0 = arith.constant 0 : i32
    return %arg0, %c0_i32 : i32, i32
  }
  func.func @transform_2(%arg0: i32) -> (i32, i32) {
    %c0_i32 = arith.constant 0 : i32
    %c0_i32_0 = arith.constant 0 : i32
    %c0_i32_1 = arith.constant 0 : i32
    return %c0_i32, %c0_i32_0 : i32, i32
  }
  func.func @transform_3(%arg0: i32) -> (i32, i32, i32) {
    %c0_i32 = arith.constant 0 : i32
    %c0_i32_0 = arith.constant 0 : i32
    %c0_i32_1 = arith.constant 0 : i32
    return %arg0, %c0_i32, %c0_i32_0 : i32, i32, i32
  }
  func.func @transform_4(%arg0: i32) -> (i32, i32, i32) {
    %c0_i32 = arith.constant 0 : i32
    %c0_i32_0 = arith.constant 0 : i32
    %c0_i32_1 = arith.constant 0 : i32
    return %arg0, %c0_i32, %c0_i32_0 : i32, i32, i32
  }
}

</mosaic_0001>

<bundles_post_ra>
// kernel: tpu_custom_call.1
= control target key start
LH: loop header
LB: loop body
LE: loop exit
PB: predicated region body
PF: predicated region fallthrough
CT: control target
= control target key end

     0   :  { %10 = vsyncpa [#allocation3], 0  ;;  %s342_s0 = inlined_call_operand.hbm [shape: f32[8,16], index: 0, kind: input, shape index: {}]   ;;  %s343_s1 = inlined_call_operand.hbm [shape: f32[8,16], index: 1, kind: input, shape index: {}]   ;;  %s344_s2 = inlined_call_operand.vmem [shape: f32[1,16], index: 2, kind: input, shape index: {}]   ;;  %s345_s3 = inlined_call_operand.hbm [shape: f32[1,1,1], index: 3, kind: output, shape index: {0}]   ;;  %s346_s4 = inlined_call_operand.hbm [shape: f32[1,1,1], index: 4, kind: output, shape index: {1}]  }
   0x1   :  { %11 = vsyncpa [#allocation6], 0 }
   0x2   :  { %12 = vsyncpa [#allocation4], 0 }
   0x3   :  { %13 = vsyncpa [#allocation9], 0  ;;  %s19_s17 = sshll.u32 %s342_s0, 4  ;;  %s290_s18 = smov [#allocation2]   ;;  %s20_s17 = int_to_ptr.hbm [resolvable:$true] %s19_s17 }
   0x4   :  { %s21_s19 = sshll.u32 %s290_s18, 4  ;;  %s30_s22 = sshll.u32 %s343_s1, 4  ;;  %s22_s19 = int_to_ptr.vmem [resolvable:$true] %s21_s19  ;;  %s31_s22 = int_to_ptr.hbm [resolvable:$true] %s30_s22 }
   0x5   :  { %24 = dma.hbm_to_vmem [thread:$0]  %s20_s17, 128, %s22_s19, [#allocation3]  }
   0x6   :  { %s291_s23 = smov [#allocation5]  }
   0x7   :  { %s32_s24 = sshll.u32 %s291_s23, 4  ;;  %s33_s24 = int_to_ptr.vmem [resolvable:$true] %s32_s24 }
   0x8   :  { %35 = dma.hbm_to_vmem [thread:$0]  %s31_s22, 128, %s33_s24, [#allocation6]  }
   0x9   :  { %282 = dma.done.wait [#allocation3], 128  }
   0xa   :  { %283 = vsyncadd [#allocation3], 4294967168 }
   0xb   :  { %284 = dma.done.wait [#allocation6], 128  }
   0xc   :  { %285 = vsyncadd [#allocation6], 4294967168  ;;  %vm49_vm0 = vcmask 130048   ;;  %v47_v0 = vld [vmem:[#allocation2] sm:$0xff]  ;;  %v46_v1 = vld [vmem:[#allocation5] sm:$0xff]  ;;  %v60_v4 = vlaneseq  ;;  %vm109_vm4 = vcmask 7168  }
   0xd   :  { %v91_v2 = vsel %vm49_vm0, %v47_v0, -inf  ;;  %v50_v3 = vsel %vm49_vm0, %v46_v1, -inf  ;;  %v179_v29 = vld [vmem:[%s344_s2] ss:$0 sm:$0xff]  ;;  %v292_v44 = vmov 0.0   ;;  %s293_s2 = smov [#allocation7]  }
   0xe   :  { %92 = vmax.xlane.f32.xlu1 %v91_v2  ;;  %51 = vmax.xlane.f32.xlu0 %v50_v3  ;;  %v61_v5 = vand.u32 127, %v60_v4  ;;  %s140_s25 = sshll.u32 %s293_s2, 4  ;;  %s142_s28 = sshll.u32 %s345_s3, 4  ;;  %vm121_vm6 = vcmask 0   ;;  %s141_s25 = int_to_ptr.vmem [resolvable:$true] %s140_s25  ;;  %s143_s28 = int_to_ptr.hbm [resolvable:$true] %s142_s28 }
   0xf   :  { %s294_s29 = smov [#allocation8]   ;;  %s153_s7 = sshll.u32 %s346_s4, 4  ;;  %s154_s7 = int_to_ptr.hbm [resolvable:$true] %s153_s7 }
  0x10   :  { %s151_s30 = sshll.u32 %s294_s29, 4  ;;  %s152_s30 = int_to_ptr.vmem [resolvable:$true] %s151_s30 }
  0x81   :  { %v93_v6 = vpop.xlane.xlu1 %92  ;;  %v52_v7 = vpop.xlane.xlu0 %51 }
  0x82   :  { %v94_v8 = vsub.f32 %v47_v0, %v93_v6  ;;  %v53_v9 = vsub.f32 %v46_v1, %v52_v7  ;;  %vm62_vm1 = vcmp.eq.f32.partialorder %v46_v1, %v52_v7 }
  0x83   :  { %v63_v10 = vsel %vm62_vm1, %v61_v5, 16 }
  0x84   :  { %v95_v11 = vmul.f32 1.442695, %v94_v8  ;;  %v54_v12 = vmul.f32 2.0, %v53_v9  ;;  %v64_v13 = vsel %vm49_vm0, %v63_v10, 2147483647 }
  0x85   :  { %v66_v14 = vshra.s32 %v64_v13, 16  ;;  %v65_v21 = vand.u32 65535, %v64_v13 }
  0x86   :  { %180 = vpow2.f32 %v95_v11  ;;  %v55_v16 = vmul.f32 1.442695, %v54_v12 }
  0x87   :  { %v68_v15 = vcvt.s32.f32 %v66_v14  ;;  %v67_v23 = vcvt.s32.f32 %v65_v21 }
  0x88   :  { %182 = vpow2.f32 %v55_v16 }
  0x89   :  { %69 = vmin.xlane.f32.xlu0 %v68_v15 }
  0x8c   :  { %v181_v17 = vpop.eup %180 }
  0x8d   :  { %v97_v18 = vsel %vm49_vm0, %v181_v17, 0.0 }
  0x8e   :  { %98 = vadd.xlane.f32.xlu2 %v97_v18  ;;  %v183_v19 = vpop.eup %182 }
  0x8f   :  { %v57_v20 = vsel %vm49_vm0, %v183_v19, 0.0 }
  0x96   :  { %58 = vadd.xlane.f32.xlu2 %v57_v20 }
  0xfc   :  { %v70_v22 = vpop.xlane.xlu0 %69 }
  0xfd   :  { %vm71_vm2 = vcmp.eq.f32.partialorder %v68_v15, %v70_v22  ;;  %v76_v25 = vcvt.f32.s32 %v70_v22 }
  0xfe   :  { %v72_v24 = vsel %vm71_vm2, %v67_v23, inf }
  0xff   :  { %73 = vmin.xlane.f32.xlu1 %v72_v24  ;;  %v77_v27 = vshll.u32 %v76_v25, 16 }
 0x101   :  { %v99_v35 = vpop.xlane.xlu2 %98 }
 0x102   :  { %184 = vlog2.f32 %v99_v35 }
 0x108   :  { %v185_v36 = vpop.eup %184 }
 0x109   :  { %v101_v37 = vmul.f32 0.6931472, %v185_v36  ;;  %v59_v38 = vpop.xlane.xlu2 %58 }
 0x10b   :  { %v102_v41 = vadd.f32 %v101_v37, %v93_v6 }
 0x172   :  { %v74_v26 = vpop.xlane.xlu1 %73 }
 0x173   :  { %v75_v28 = vcvt.f32.s32 %v74_v26 }
 0x175   :  { %v78_v30 = vadd.s32 %v77_v27, %v75_v28 }
 0x177   :  { %vm79_vm3 = vcmp.eq.s32.totalorder %v61_v5, %v78_v30 }
 0x178   :  { %v103_v31 = vsel %vm79_vm3, %v47_v0, 0.0  ;;  %v83_v32 = vsel %vm79_vm3, %v179_v29, 0.0 }
 0x179   :  { %v104_v33 = vsel %vm49_vm0, %v103_v31, 0.0  ;;  %v84_v34 = vsel %vm49_vm0, %v83_v32, 0.0 }
 0x17a   :  { %105 = vadd.xlane.f32.xlu1 %v104_v33  ;;  %85 = vadd.xlane.f32.xlu0 %v84_v34 }
 0x1ed   :  { %v106_v39 = vpop.xlane.xlu1 %105  ;;  %v86_v40 = vpop.xlane.xlu0 %85 }
 0x1ee   :  { %v87_v42 = vmul.f32 %v86_v40, %v59_v38  ;;  %v107_v43 = vsub.f32 %v102_v41, %v106_v39 }
 0x1f0   :  { %vm88_vm5 = vcmp.lt.f32.partialorder %v87_v42, 1.0 }
 0x1f1   :  { %v169_v45 = vsel %vm88_vm5, 1.0, %v292_v44 }
 0x1f2   :  { %v123_v46 = vsel %vm109_vm4, %v169_v45, 0.0  ;;  %v108_v47 = vmul.f32 %v169_v45, %v107_v43 }
 0x1f3   :  { %124 = vadd.xlane.f32.xlu0 %v123_v46 }
 0x1f4   :  { %v110_v48 = vsel %vm109_vm4, %v108_v47, 0.0 }
 0x1f5   :  { %111 = vadd.xlane.f32.xlu2 %v110_v48 }
 0x266   :  { %v125_v49 = vpop.xlane.xlu0 %124 }
 0x267   :  { %v126_v50 = vrot.slane %v125_v49, 4 }
 0x268   :  { %v112_v51 = vpop.xlane.xlu2 %111 }
 0x269   :  { %v127_v52 = vadd.f32 %v126_v50, %v125_v49  ;;  %v113_v53 = vrot.slane %v112_v51, 4 }
 0x26b   :  { %v128_v54 = vrot.slane %v127_v52, 2  ;;  %v114_v55 = vadd.f32 %v113_v53, %v112_v51 }
 0x26d   :  { %v129_v56 = vadd.f32 %v128_v54, %v127_v52  ;;  %v115_v57 = vrot.slane %v114_v55, 2 }
 0x26f   :  { %v116_v58 = vadd.f32 %v115_v57, %v114_v55  ;;  %v130_v59 = vrot.slane %v129_v56, 1 }
 0x271   :  { %v117_v60 = vrot.slane %v116_v58, 1  ;;  %v131_v62 = vadd.f32 %v130_v59, %v129_v56 }
 0x273   :  { %v118_v61 = vadd.f32 %v117_v60, %v116_v58 }
 0x275   :  { %170 = vpush %v118_v61 }
 0x276   :  { %172 = vpush %v131_v62 }
 0x2a6   :  { %s171_s8 = spop %170 }
 0x2a7   :  { %v120_v63 = vstv %s171_s8  ;;  %s173_s9 = spop %172 }
 0x2a8   :  { %122 = vst.msk [vmem:[#allocation7] sm:$0x1] %vm121_vm6, %v120_v63  ;;  %v133_v0 = vstv %s173_s9 }
 0x2a9   :  { %134 = vst.msk [vmem:[#allocation8] sm:$0x1] %vm121_vm6, %v133_v0  ;;  %145 = dma.vmem_to_hbm [thread:$0]  %s141_s25, 16, %s143_s28, [#allocation4]  }
 0x2aa   :  { %156 = dma.vmem_to_hbm [thread:$0]  %s152_s30, 16, %s154_s7, [#allocation9]  }
 0x2ab   :  { %286 = dma.done.wait [#allocation4], 16  }
 0x2ac   :  { %287 = vsyncadd [#allocation4], 4294967280 }
 0x2ad   :  { %288 = dma.done.wait [#allocation9], 16  }
 0x2ae   :  { %289 = vsyncadd [#allocation9], 4294967280 }
 0x2af   :  { %165 = vsyncpa [#allocation3], 1 }
 0x2b0   :  { %166 = vsyncpa [#allocation6], 1 }
 0x2b1   :  { %167 = vsyncpa [#allocation4], 1 }
 0x2b2   :  { %168 = vsyncpa [#allocation9], 1 }

</bundles_post_ra>
